<compile_context>
chip_gen: v7x
topology: tpu7x:2x2x1
jax: 0.10.0
libtpu: 0.0.40
codegen_flags: <defaults>
</compile_context>

<pallas_src>
import functools
import math

import jax
import jax.numpy as jnp
from jax import lax
from jax.experimental import pallas as pl
from jax.experimental.pallas import tpu as pltpu


# ----------------------------------------------------------------------------- helpers
def _pick_tile(dim: int, candidates) -> int:
    """Largest candidate that evenly divides `dim`, else the full dim (always legal)."""
    for c in candidates:
        if dim >= c and dim % c == 0:
            return c
    return dim


# ----------------------------------------------------------------------------- plain linear (QKV)
def _linear_kernel(x_ref, w_ref, b_ref, o_ref):
    # o_ref (f32) is the accumulator: resident across the innermost k axis.
    k = pl.program_id(2)
    part = jnp.dot(x_ref[...], w_ref[...], preferred_element_type=jnp.float32)

    @pl.when(k == 0)
    def _():
        o_ref[...] = part            # assign on first k (no zero-init pass)

    @pl.when(k != 0)
    def _():
        o_ref[...] = o_ref[...] + part

    @pl.when(k == pl.num_programs(2) - 1)
    def _():
        o_ref[...] = o_ref[...] + b_ref[...]


def linear_pallas(x2d, w, b):
    """x2d: (M, K) f32, w: (K, N), b: (N,) -> (M, N) f32."""
    M, K = x2d.shape
    K2, N = w.shape
    assert K == K2 and x2d.dtype == jnp.float32  # accumulate directly in f32 output block
    tm = _pick_tile(M, (512, 256, 128, 64, 32, 16, 8))
    tn = _pick_tile(N, (512, 256, 128))
    tk = _pick_tile(K, (512, 256, 128))
    grid = (M // tm, N // tn, K // tk)

    return pl.pallas_call(
        _linear_kernel,
        out_shape=jax.ShapeDtypeStruct((M, N), jnp.float32),
        grid_spec=pltpu.PrefetchScalarGridSpec(
            num_scalar_prefetch=0,
            grid=grid,
            in_specs=[
                pl.BlockSpec((tm, tk), lambda i, j, k: (i, k)),
                pl.BlockSpec((tk, tn), lambda i, j, k: (k, j)),
                pl.BlockSpec((1, tn), lambda i, j, k: (0, j)),
            ],
            out_specs=pl.BlockSpec((tm, tn), lambda i, j, k: (i, j)),
        ),
        compiler_params=pltpu.CompilerParams(
            dimension_semantics=("parallel", "parallel", "arbitrary")),
    )(x2d, w, b.reshape(1, N))


# ------------------------------------------------------------- linear + residual + LayerNorm fused
def _linear_res_ln_kernel(x_ref, w_ref, b_ref, r_ref, g_ref, bb_ref, o_ref, *, eps):
    k = pl.program_id(1)
    part = jnp.dot(x_ref[...], w_ref[...], preferred_element_type=jnp.float32)

    @pl.when(k == 0)
    def _():
        o_ref[...] = part

    @pl.when(k != 0)
    def _():
        o_ref[...] = o_ref[...] + part

    @pl.when(k == pl.num_programs(1) - 1)
    def _():
        y = o_ref[...] + b_ref[...] + r_ref[...]
        mean = jnp.mean(y, axis=-1, keepdims=True)
        var = jnp.mean(jnp.square(y - mean), axis=-1, keepdims=True)
        yn = (y - mean) * lax.rsqrt(var + eps)
        o_ref[...] = yn * g_ref[...] + bb_ref[...]


def linear_res_ln_pallas(x2d, w, b, res2d, gamma, beta, eps=1e-5):
    """LayerNorm(x2d @ w + b + res2d); output tile spans full N so LN fuses into epilogue."""
    M, K = x2d.shape
    K2, N = w.shape
    assert K == K2 and res2d.shape == (M, N) and x2d.dtype == jnp.float32
    tm = _pick_tile(M, (512, 256, 128, 64, 32, 16, 8))
    tk = _pick_tile(K, (512, 256, 128))
    grid = (M // tm, K // tk)

    return pl.pallas_call(
        functools.partial(_linear_res_ln_kernel, eps=eps),
        out_shape=jax.ShapeDtypeStruct((M, N), jnp.float32),
        grid_spec=pltpu.PrefetchScalarGridSpec(
            num_scalar_prefetch=0,
            grid=grid,
            in_specs=[
                pl.BlockSpec((tm, tk), lambda i, k: (i, k)),
                pl.BlockSpec((tk, N), lambda i, k: (k, 0)),
                pl.BlockSpec((1, N), lambda i, k: (0, 0)),
                pl.BlockSpec((tm, N), lambda i, k: (i, 0)),
                pl.BlockSpec((1, N), lambda i, k: (0, 0)),
                pl.BlockSpec((1, N), lambda i, k: (0, 0)),
            ],
            out_specs=pl.BlockSpec((tm, N), lambda i, k: (i, 0)),
        ),
        compiler_params=pltpu.CompilerParams(
            dimension_semantics=("parallel", "arbitrary")),
    )(x2d, w, b.reshape(1, N), res2d, gamma.reshape(1, N), beta.reshape(1, N))


# ----------------------------------------------------- FFN (FF1+ReLU+FF2) + residual + LN fused
def _ffn_kernel(x_ref, w1_ref, b1_ref, w2_ref, b2_ref, g_ref, bb_ref, o_ref, *, eps):
    f = pl.program_id(1)
    x = x_ref[...]                              # (tm, D) — also the residual
    h = jnp.dot(x, w1_ref[...], preferred_element_type=jnp.float32) + b1_ref[...]
    h = jnp.maximum(h, 0.0)                     # ReLU intermediate stays in VMEM/vregs
    part = jnp.dot(h, w2_ref[...], preferred_element_type=jnp.float32)

    @pl.when(f == 0)
    def _():
        o_ref[...] = part

    @pl.when(f != 0)
    def _():
        o_ref[...] = o_ref[...] + part

    @pl.when(f == pl.num_programs(1) - 1)
    def _():
        y = o_ref[...] + b2_ref[...] + x        # residual = FFN input
        mean = jnp.mean(y, axis=-1, keepdims=True)
        var = jnp.mean(jnp.square(y - mean), axis=-1, keepdims=True)
        yn = (y - mean) * lax.rsqrt(var + eps)
        o_ref[...] = yn * g_ref[...] + bb_ref[...]


def ffn_res_ln_pallas(x2d, w1, b1, w2, b2, gamma, beta, eps=1e-5):
    """LayerNorm(x + relu(x@w1+b1)@w2 + b2); d_ff is the reduction grid axis."""
    M, D = x2d.shape
    D2, F = w1.shape
    assert D == D2 and w2.shape == (F, D) and x2d.dtype == jnp.float32
    tm = _pick_tile(M, (512, 256, 128, 64, 32, 16, 8))
    tf = _pick_tile(F, (512, 256, 128))
    grid = (M // tm, F // tf)

    return pl.pallas_call(
        functools.partial(_ffn_kernel, eps=eps),
        out_shape=jax.ShapeDtypeStruct((M, D), jnp.float32),
        grid_spec=pltpu.PrefetchScalarGridSpec(
            num_scalar_prefetch=0,
            grid=grid,
            in_specs=[
                pl.BlockSpec((tm, D), lambda i, f: (i, 0)),
                pl.BlockSpec((D, tf), lambda i, f: (0, f)),
                pl.BlockSpec((1, tf), lambda i, f: (0, f)),
                pl.BlockSpec((tf, D), lambda i, f: (f, 0)),
                pl.BlockSpec((1, D), lambda i, f: (0, 0)),
                pl.BlockSpec((1, D), lambda i, f: (0, 0)),
                pl.BlockSpec((1, D), lambda i, f: (0, 0)),
            ],
            out_specs=pl.BlockSpec((tm, D), lambda i, f: (i, 0)),
        ),
        compiler_params=pltpu.CompilerParams(
            dimension_semantics=("parallel", "arbitrary")),
    )(x2d, w1, b1.reshape(1, F), w2, b2.reshape(1, D),
      gamma.reshape(1, D), beta.reshape(1, D))


# ----------------------------------------------------------------------------- attention
def _attn_kernel(qkv_ref, o_ref, w_ref, *, nheads, tq):
    # qkv_ref: (S, 3D) for the current batch; columns are [q | k | v], head h uses
    # columns h*Dh:(h+1)*Dh within each of q/k/v.  All heads handled here; the context
    # is written as one lane-dense (tq, D) block.
    S, threeD = qkv_ref.shape
    D = threeD // 3
    Dh = D // nheads
    scale = 1.0 / math.sqrt(Dh)

    kvrows = qkv_ref[...]                                  # (S, 3D)
    if tq == S:
        qrows = kvrows
    else:
        row = pl.multiple_of(pl.program_id(1) * tq, tq)
        qrows = qkv_ref[pl.ds(row, tq), :]                 # (tq, 3D)

    q = qrows[:, 0:D]
    k = kvrows[:, D:2 * D]
    v = kvrows[:, 2 * D:3 * D]

    # TODO(synk): additive attn_mask / key_padding_mask support (module gets None here).
    ctx_parts = []
    wsum = None
    for h in range(nheads):                                # static head loop
        sl = slice(h * Dh, (h + 1) * Dh)
        qh = q[:, sl]
        kh = k[:, sl]
        vh = v[:, sl]
        s = lax.dot_general(qh, kh, (((1,), (1,)), ((), ())),
                            preferred_element_type=jnp.float32) * scale
        s = s - jnp.max(s, axis=-1, keepdims=True)
        p = jnp.exp(s)
        inv = pl.reciprocal(jnp.sum(p, axis=-1, keepdims=True), approx=False)
        p = p * inv                                        # one reciprocal/row, then multiply
        ctx_parts.append(jnp.dot(p, vh, preferred_element_type=jnp.float32))
        wsum = p if wsum is None else wsum + p

    o_ref[...] = jnp.concatenate(ctx_parts, axis=-1).astype(o_ref.dtype)
    w_ref[...] = (wsum * (1.0 / nheads)).astype(w_ref.dtype)


def attention_pallas(qkv, nheads):
    """qkv: (B, S, 3D) -> (ctx (B, S, D), head-averaged weights (B, S, S))."""
    B, S, threeD = qkv.shape
    D = threeD // 3
    tq = _pick_tile(S, (256, 128))          # query tiling bounds (S,S) VMEM; 2nd parallel axis

    ctx, attn_w = pl.pallas_call(
        functools.partial(_attn_kernel, nheads=nheads, tq=tq),
        out_shape=(jax.ShapeDtypeStruct((B, S, D), jnp.float32),
                   jax.ShapeDtypeStruct((B, S, S), jnp.float32)),
        grid_spec=pltpu.PrefetchScalarGridSpec(
            num_scalar_prefetch=0,
            grid=(B, S // tq),
            in_specs=[pl.BlockSpec((None, S, threeD), lambda b, qi: (b, 0, 0))],
            out_specs=[pl.BlockSpec((None, tq, D), lambda b, qi: (b, qi, 0)),
                       pl.BlockSpec((None, tq, S), lambda b, qi: (b, qi, 0))],
        ),
        compiler_params=pltpu.CompilerParams(
            dimension_semantics=("parallel", "parallel"),
            vmem_limit_bytes=48 * 1024 * 1024),
    )(qkv)
    return ctx, attn_w


# ----------------------------------------------------------------------------- standalone LN (final norm)
def _ln_kernel(x_ref, g_ref, b_ref, o_ref, *, eps):
    y = x_ref[...].astype(jnp.float32)
    mean = jnp.mean(y, axis=-1, keepdims=True)
    var = jnp.mean(jnp.square(y - mean), axis=-1, keepdims=True)
    yn = (y - mean) * lax.rsqrt(var + eps)
    o_ref[...] = (yn * g_ref[...] + b_ref[...]).astype(o_ref.dtype)


def layernorm_pallas(x2d, gamma, beta, eps=1e-5):
    R, D = x2d.shape
    tr = _pick_tile(R, (512, 256, 128, 64, 32, 16, 8))
    return pl.pallas_call(
        functools.partial(_ln_kernel, eps=eps),
        out_shape=jax.ShapeDtypeStruct((R, D), x2d.dtype),
        grid_spec=pltpu.PrefetchScalarGridSpec(
            num_scalar_prefetch=0,
            grid=(R // tr,),
            in_specs=[pl.BlockSpec((tr, D), lambda i: (i, 0)),
                      pl.BlockSpec((1, D), lambda i: (0, 0)),
                      pl.BlockSpec((1, D), lambda i: (0, 0))],
            out_specs=pl.BlockSpec((tr, D), lambda i: (i, 0)),
        ),
        compiler_params=pltpu.CompilerParams(dimension_semantics=("parallel",)),
    )(x2d, gamma.reshape(1, D), beta.reshape(1, D))


# ----------------------------------------------------------------------------- encoder layer / stack
def encoder_layer_forward(x2d, p, nhead, B, S, D):
    """Post-norm TransformerEncoderLayer on batch-first flattened (B*S, D) activations."""
    qkv = linear_pallas(x2d, p["w_qkv"], p["b_qkv"])                    # (B*S, 3D)
    ctx, attn_w = attention_pallas(qkv.reshape(B, S, 3 * D), nhead)     # (B,S,D), (B,S,S)
    y1 = linear_res_ln_pallas(ctx.reshape(B * S, D), p["w_out"], p["b_out"],
                              x2d, p["ln1_g"], p["ln1_b"])              # fused out-proj+add+LN
    y2 = ffn_res_ln_pallas(y1, p["w_ff1"], p["b_ff1"], p["w_ff2"], p["b_ff2"],
                           p["ln2_g"], p["ln2_b"])                      # fused FFN+add+LN
    return y2, attn_w


def custom_transformer_encoder_forward(src, layer_params, nhead, norm_params=None):
    """Matches CustomTransformerEncoder.forward: returns (output, attn_weights_list)."""
    S, B, D = src.shape
    # Single layout change for the whole stack (seq-first -> batch-first) and back.
    out = jnp.transpose(src, (1, 0, 2)).reshape(B * S, D)
    attn_weights_list = []
    for p in layer_params:
        out, w = encoder_layer_forward(out, p, nhead, B, S, D)
        attn_weights_list.append(w)
    if norm_params is not None:
        out = layernorm_pallas(out, norm_params["g"], norm_params["b"])
    out = jnp.transpose(out.reshape(B, S, D), (1, 0, 2))
    return out, attn_weights_list


# ----------------------------------------------------------------------------- pure-JAX reference
def _ref_ln(x, g, b, eps=1e-5):
    m = jnp.mean(x, axis=-1, keepdims=True)
    v = jnp.mean(jnp.square(x - m), axis=-1, keepdims=True)
    return (x - m) / jnp.sqrt(v + eps) * g + b


def ref_layer(x, p, nhead, eps=1e-5):
    S, B, D = x.shape
    H = nhead
    Dh = D // H
    hp = lax.Precision.HIGHEST
    x2 = x.reshape(S * B, D)
    qkv = jnp.dot(x2, p["w_qkv"], precision=hp) + p["b_qkv"]
    qkv = qkv.reshape(S, B, 3, H, Dh)
    q = jnp.transpose(qkv[:, :, 0], (1, 2, 0, 3))
    k = jnp.transpose(qkv[:, :, 1], (1, 2, 0, 3))
    v = jnp.transpose(qkv[:, :, 2], (1, 2, 0, 3))
    scores = jnp.einsum("bhqd,bhkd->bhqk", q, k, precision=hp) / math.sqrt(Dh)
    probs = jax.nn.softmax(scores, axis=-1)
    ctx = jnp.einsum("bhqk,bhkd->bhqd", probs, v, precision=hp)
    ctx2 = jnp.transpose(ctx, (2, 0, 1, 3)).reshape(S * B, D)
    attn_out = jnp.dot(ctx2, p["w_out"], precision=hp) + p["b_out"]
    y1 = _ref_ln(x2 + attn_out, p["ln1_g"], p["ln1_b"], eps)
    h = jnp.maximum(jnp.dot(y1, p["w_ff1"], precision=hp) + p["b_ff1"], 0.0)
    h = jnp.dot(h, p["w_ff2"], precision=hp) + p["b_ff2"]
    y2 = _ref_ln(y1 + h, p["ln2_g"], p["ln2_b"], eps)
    return y2.reshape(S, B, D), jnp.mean(probs, axis=1)


def ref_encoder_forward(src, layer_params, nhead, norm_params=None):
    out = src
    ws = []
    for p in layer_params:
        out, w = ref_layer(out, p, nhead)
        ws.append(w)
    if norm_params is not None:
        out = _ref_ln(out, norm_params["g"], norm_params["b"])
    return out, ws


# ----------------------------------------------------------------------------- params
def init_layer_params(key, d_model, dim_ff):
    ks = jax.random.split(key, 6)
    s = 0.1
    return {
        "w_qkv": jax.random.normal(ks[0], (d_model, 3 * d_model), jnp.float32) * s,
        "b_qkv": jax.random.normal(ks[1], (3 * d_model,), jnp.float32) * s,
        "w_out": jax.random.normal(ks[2], (d_model, d_model), jnp.float32) * s,
        "b_out": jnp.zeros((d_model,), jnp.float32),
        "ln1_g": jnp.ones((d_model,), jnp.float32),
        "ln1_b": jnp.zeros((d_model,), jnp.float32),
        "w_ff1": jax.random.normal(ks[3], (d_model, dim_ff), jnp.float32) * s,
        "b_ff1": jax.random.normal(ks[4], (dim_ff,), jnp.float32) * s,
        "w_ff2": jax.random.normal(ks[5], (dim_ff, d_model), jnp.float32) * s,
        "b_ff2": jnp.zeros((d_model,), jnp.float32),
        "ln2_g": jnp.ones((d_model,), jnp.float32),
        "ln2_b": jnp.zeros((d_model,), jnp.float32),
    }


# ----------------------------------------------------------------------------- main
if __name__ == "__main__":
    SEQ, BATCH, D_MODEL, NHEAD, D_FF, N_LAYERS = 8, 2, 32, 4, 64, 2
    assert D_MODEL % NHEAD == 0

    key = jax.random.PRNGKey(0)
    kx, *lkeys = jax.random.split(key, N_LAYERS + 1)
    src = jax.random.normal(kx, (SEQ, BATCH, D_MODEL), dtype=jnp.float32)
    layer_params = [init_layer_params(k, D_MODEL, D_FF) for k in lkeys]
    norm_params = {"g": jnp.ones((D_MODEL,), jnp.float32),
                   "b": jnp.zeros((D_MODEL,), jnp.float32)}

    out, attn_list = custom_transformer_encoder_forward(src, layer_params, NHEAD, norm_params)
    out = jax.block_until_ready(out)
    attn_list = [jax.block_until_ready(a) for a in attn_list]

    ref_out, ref_attn = ref_encoder_forward(src, layer_params, NHEAD, norm_params)

    assert out.shape == (SEQ, BATCH, D_MODEL) and out.dtype == src.dtype
    assert len(attn_list) == N_LAYERS
    for a in attn_list:
        assert a.shape == (BATCH, SEQ, SEQ)
    assert jnp.allclose(out, ref_out, atol=1e-3, rtol=1e-3), \
        f"max diff {jnp.max(jnp.abs(out - ref_out))}"
    for a, ra in zip(attn_list, ref_attn):
        assert jnp.allclose(a, ra, atol=1e-3, rtol=1e-3), \
            f"max attn diff {jnp.max(jnp.abs(a - ra))}"

    print("KERNEL_OK")
</pallas_src>

<mosaic_0001>
module attributes {stable_mosaic.version = 11 : i64} {
  func.func @_linear_kernel(%arg0: i32, %arg1: i32, %arg2: i32, %arg3: memref<16x32xf32, #tpu.memory_space<vmem>>, %arg4: memref<32x96xf32, #tpu.memory_space<vmem>>, %arg5: memref<1x96xf32, #tpu.memory_space<vmem>>, %arg6: memref<16x96xf32, #tpu.memory_space<vmem>>) attributes {dimension_semantics = [#tpu.dimension_semantics<parallel>, #tpu.dimension_semantics<parallel>, #tpu.dimension_semantics<arbitrary>], iteration_bounds = array<i64: 1, 1, 1>, scalar_prefetch = 0 : i64, scratch_operands = 0 : i64, tpu.core_type = #tpu.core_type<tc>, window_params = [{transform_indices = @transform_0, window_bounds = array<i64: 16, 32>}, {transform_indices = @transform_1, window_bounds = array<i64: 32, 96>}, {transform_indices = @transform_2, window_bounds = array<i64: 1, 96>}, {transform_indices = @transform_3, window_bounds = array<i64: 16, 96>}]} {
    %c0 = arith.constant 0 : index
    %c0_0 = arith.constant 0 : index
    %0 = vector.load %arg3[%c0, %c0_0] : memref<16x32xf32, #tpu.memory_space<vmem>>, vector<16x32xf32>
    %c0_1 = arith.constant 0 : index
    %c0_2 = arith.constant 0 : index
    %1 = vector.load %arg4[%c0_1, %c0_2] : memref<32x96xf32, #tpu.memory_space<vmem>>, vector<32x96xf32>
    %cst = arith.constant dense<0.000000e+00> : vector<16x96xf32>
    %2 = tpu.matmul %0, %1, %cst {dimension_numbers = #tpu.dot_dimension_numbers<[1], [0], [0], [1], [0, 0, 1, 1], [], []>} : vector<16x32xf32>, vector<32x96xf32>, vector<16x96xf32> -> vector<16x96xf32>
    %c0_i32 = arith.constant 0 : i32
    %3 = arith.cmpi eq, %arg2, %c0_i32 : i32
    %4 = arith.extui %3 : i1 to i32
    %c0_i32_3 = arith.constant 0 : i32
    %5 = arith.cmpi ne, %4, %c0_i32_3 : i32
    scf.if %5 {
      %c0_8 = arith.constant 0 : index
      %c0_9 = arith.constant 0 : index
      %12 = vector.load %arg6[%c0_8, %c0_9] : memref<16x96xf32, #tpu.memory_space<vmem>>, vector<16x96xf32>
      tpu.vector_store %arg6[%c0_8, %c0_9], %2 {strides = array<i32>} : memref<16x96xf32, #tpu.memory_space<vmem>>, vector<16x96xf32>,
    } else {
    }
    %c0_i32_4 = arith.constant 0 : i32
    %6 = arith.cmpi ne, %arg2, %c0_i32_4 : i32
    %7 = arith.extui %6 : i1 to i32
    %c0_i32_5 = arith.constant 0 : i32
    %8 = arith.cmpi ne, %7, %c0_i32_5 : i32
    scf.if %8 {
      %c0_8 = arith.constant 0 : index
      %c0_9 = arith.constant 0 : index
      %12 = vector.load %arg6[%c0_8, %c0_9] : memref<16x96xf32, #tpu.memory_space<vmem>>, vector<16x96xf32>
      %13 = arith.addf %12, %2 : vector<16x96xf32>
      %c0_10 = arith.constant 0 : index
      %c0_11 = arith.constant 0 : index
      %14 = vector.load %arg6[%c0_10, %c0_11] : memref<16x96xf32, #tpu.memory_space<vmem>>, vector<16x96xf32>
      tpu.vector_store %arg6[%c0_10, %c0_11], %13 {strides = array<i32>} : memref<16x96xf32, #tpu.memory_space<vmem>>, vector<16x96xf32>,
    } else {
    }
    %c0_i32_6 = arith.constant 0 : i32
    %9 = arith.cmpi eq, %arg2, %c0_i32_6 : i32
    %10 = arith.extui %9 : i1 to i32
    %c0_i32_7 = arith.constant 0 : i32
    %11 = arith.cmpi ne, %10, %c0_i32_7 : i32
    scf.if %11 {
      %c0_8 = arith.constant 0 : index
      %c0_9 = arith.constant 0 : index
      %12 = vector.load %arg6[%c0_8, %c0_9] : memref<16x96xf32, #tpu.memory_space<vmem>>, vector<16x96xf32>
      %c0_10 = arith.constant 0 : index
      %c0_11 = arith.constant 0 : index
      %13 = vector.load %arg5[%c0_10, %c0_11] : memref<1x96xf32, #tpu.memory_space<vmem>>, vector<1x96xf32>
      %14 = vector.broadcast %13 : vector<1x96xf32> to vector<16x96xf32>
      %15 = arith.addf %12, %14 : vector<16x96xf32>
      %c0_12 = arith.constant 0 : index
      %c0_13 = arith.constant 0 : index
      %16 = vector.load %arg6[%c0_12, %c0_13] : memref<16x96xf32, #tpu.memory_space<vmem>>, vector<16x96xf32>
      tpu.vector_store %arg6[%c0_12, %c0_13], %15 {strides = array<i32>} : memref<16x96xf32, #tpu.memory_space<vmem>>, vector<16x96xf32>,
    } else {
    }
    return
  }
  func.func @transform_0(%arg0: i32, %arg1: i32, %arg2: i32) -> (i32, i32) {
    %c0_i32 = arith.constant 0 : i32
    return %arg0, %arg2 : i32, i32
  }
  func.func @transform_1(%arg0: i32, %arg1: i32, %arg2: i32) -> (i32, i32) {
    %c0_i32 = arith.constant 0 : i32
    return %arg2, %arg1 : i32, i32
  }
  func.func @transform_2(%arg0: i32, %arg1: i32, %arg2: i32) -> (i32, i32) {
    %c0_i32 = arith.constant 0 : i32
    %c0_i32_0 = arith.constant 0 : i32
    return %c0_i32, %arg1 : i32, i32
  }
  func.func @transform_3(%arg0: i32, %arg1: i32, %arg2: i32) -> (i32, i32) {
    %c0_i32 = arith.constant 0 : i32
    return %arg0, %arg1 : i32, i32
  }
}

</mosaic_0001>

<bundles_post_ra>
// kernel: tpu_custom_call.1
= control target key start
LH: loop header
LB: loop body
LE: loop exit
PB: predicated region body
PF: predicated region fallthrough
CT: control target
= control target key end

     0   :  { %8 = vsyncpa [#allocation3], 0  ;;  %s362_s0 = inlined_call_operand.hbm [shape: f32[16,32], index: 0, kind: input, shape index: {}]   ;;  %s363_s1 = inlined_call_operand.hbm [shape: f32[32,96], index: 1, kind: input, shape index: {}]   ;;  %s364_s2 = inlined_call_operand.vmem [shape: f32[1,96], index: 2, kind: input, shape index: {}]   ;;  %s365_s3 = inlined_call_operand.hbm [shape: f32[16,96], index: 3, kind: output, shape index: {}]  }
   0x1   :  { %9 = vsyncpa [#allocation6], 0 }
   0x2   :  { %10 = vsyncpa [#allocation4], 0  ;;  %s289_s12 = smov [#allocation2]   ;;  %s217_s16 = scalar_lea.hbm %s362_s0, 256 }
   0x3   :  { %s16_s13 = sshll.u32 %s289_s12, 4  ;;  %p218_p0 = scmp.ne.s32.totalorder %s362_s0, %s217_s16  ;;  %s17_s13 = int_to_ptr.vmem [resolvable:$true] %s16_s13 }
   0x4   :  { %p221_p1 = scmp.lt.u32.totalorder %s217_s16, %s362_s0 }
   0x6   :  { %p223_p2 = pnand %p221_p1, %p218_p0 }
   0x8   :  { %226 = shalt.err (!%p223_p2)
}
   0x9   :  { %s227_s21 = scalar_lea.vmem %s17_s13, 256  ;;  %p232_p4 = scmp.lt.s32.totalorder %s17_s13, %s17_s13 }
   0xa   :  { %p228_p3 = scmp.ne.s32.totalorder %s17_s13, %s227_s21  ;;  %p233_p5 = scmp.lt.s32.totalorder %s227_s21, %s227_s21 }
   0xc   :  { %p234_p6 = por %p233_p5, %p232_p4 }
   0xe   :  { %p235_p7 = pnand %p234_p6, %p228_p3 }
  0x10   :  { %238 = shalt.err (!%p235_p7)
}
  0x11   :  { %s290_s22 = smov 128   ;;  %s291_s23 = smov 8  }
  0x12   :  { %22 = dma.hbm_to_vmem [thread:$0]  %s362_s0, 256, %s17_s13, [#allocation3], %s290_s22, %s290_s22, %s291_s23  }
  0x13   :  { %s292_s26 = smov [#allocation5]   ;;  %s239_s30 = scalar_lea.hbm %s363_s1, 512 }
  0x14   :  { %s28_s27 = sshll.u32 %s292_s26, 4  ;;  %p240_p8 = scmp.ne.s32.totalorder %s363_s1, %s239_s30  ;;  %s29_s27 = int_to_ptr.vmem [resolvable:$true] %s28_s27 }
  0x15   :  { %p243_p9 = scmp.lt.u32.totalorder %s239_s30, %s363_s1 }
  0x17   :  { %p245_p10 = pnand %p243_p9, %p240_p8 }
  0x19   :  { %248 = shalt.err (!%p245_p10)
}
  0x1a   :  { %s249_s8 = scalar_lea.vmem %s29_s27, 512  ;;  %p254_p12 = scmp.lt.s32.totalorder %s29_s27, %s29_s27 }
  0x1b   :  { %p250_p11 = scmp.ne.s32.totalorder %s29_s27, %s249_s8  ;;  %p255_p13 = scmp.lt.s32.totalorder %s249_s8, %s249_s8 }
  0x1d   :  { %p256_p0 = por %p255_p13, %p254_p12 }
  0x1f   :  { %p257_p1 = pnand %p256_p0, %p250_p11 }
  0x21   :  { %260 = shalt.err (!%p257_p1)
}
  0x22   :  { %34 = dma.hbm_to_vmem [thread:$0]  %s363_s1, 512, %s29_s27, [#allocation6], %s290_s22, %s290_s22, %s291_s23  }
  0x23   :  { %283 = dma.done.wait [#allocation3], 256  }
  0x24   :  { %284 = vsyncadd [#allocation3], 4294967040 }
  0x25   :  { %285 = dma.done.wait [#allocation6], 512  }
  0x26   :  { %286 = vsyncadd [#allocation6], 4294966784  ;;  %vm49_vm0 = vcmask 261120   ;;  %v45_v0 = vld [vmem:[#allocation5] sm:$0xff]  ;;  %v46_v1 = vld [vmem:[#allocation5 + $0x8] sm:$0xff]  ;;  %vm135_vm1 = vcmask 785408  }
  0x27   :  { %v47_v2 = vld [vmem:[#allocation5 + $0x10] sm:$0xff]  ;;  %v204_v3 = vpack.c.bf16 %v46_v1, %v45_v0  ;;  %v48_v4 = vld [vmem:[#allocation5 + $0x18] sm:$0xff]  ;;  %s293_s11 = smov [#allocation7]  }
  0x28   :  { %v43_v5 = vld [vmem:[#allocation2] sm:$0xff]  ;;  %v208_v6 = vpack.c.bf16 %v48_v4, %v47_v2  ;;  %v44_v7 = vld [vmem:[#allocation2 + $0x8] sm:$0xff]  ;;  %s171_s12 = sshll.u32 %s293_s11, 4  ;;  %s172_s12 = int_to_ptr.vmem [resolvable:$true] %s171_s12 }
  0x29   :  { %201 = vmatprep.mubr.msk.f32.mxu0 %vm49_vm0, %v43_v5  ;;  %205 = vmatprep.subr.bf16.mxu0 %v204_v3  ;;  %v186_v10 = vld [vmem:[%s364_s2] ss:$0 sm:$0xff]  ;;  %s261_s13 = scalar_lea.vmem %s172_s12, 256  ;;  %p266_p3 = scmp.lt.s32.totalorder %s172_s12, %s172_s12 }
  0x2a   :  { %207 = vmatpush3.bf16.msra.mxu0 %v204_v3  ;;  %p262_p2 = scmp.ne.s32.totalorder %s172_s12, %s261_s13  ;;  %p267_p4 = scmp.lt.s32.totalorder %s261_s13, %s261_s13 }
  0x2b   :  { %209 = vmatprep.subr.bf16.mxu0 %v208_v6 }
  0x2c   :  { %p268_p5 = por %p267_p4, %p266_p3 }
  0x2e   :  { %211 = vmatpush3.bf16.msra.mxu0 %v208_v6  ;;  %p269_p6 = pnand %p268_p5, %p262_p2 }
  0x31   :  { %202 = vmatmul.mubr.msk.f32.vlgmr.msra.gmra.mrb[0].mxu0 %vm49_vm0, %v44_v7 }
 0x104   :  { %v203_v8 = vpop.f32.mrb[0].mxu0 }
 0x105   :  { %137 = vst.msk [vmem:[#allocation7 + $0x8] sm:$0xff] %vm135_vm1, %v203_v8  ;;  %v122_v9 = vpop.f32.mrb[1].mxu0 }
 0x106   :  { %136 = vst.msk [vmem:[#allocation7] sm:$0xff] %vm135_vm1, %v122_v9 }
 0x10c   :  { %v153_v11 = vld [vmem:[#allocation7 + $0x8] sm:$0xff] }
 0x10d   :  { %v152_v12 = vld [vmem:[#allocation7] sm:$0xff]  ;;  %v162_v13 = vadd.f32 %v186_v10, %v153_v11 }
 0x10e   :  { %v161_v14 = vadd.f32 %v186_v10, %v152_v12 }
 0x10f   :  { %165 = vst.msk [vmem:[#allocation7 + $0x8] sm:$0xff] %vm135_vm1, %v162_v13 }
 0x110   :  { %164 = vst.msk [vmem:[#allocation7] sm:$0xff] %vm135_vm1, %v161_v14 }
 0x111   :  { %272 = shalt.err (!%p269_p6)
}
 0x112   :  { %s273_s2 = scalar_lea.hbm %s365_s3, 256 }
 0x113   :  { %p274_p7 = scmp.ne.s32.totalorder %s365_s3, %s273_s2  ;;  %p277_p8 = scmp.lt.u32.totalorder %s273_s2, %s365_s3 }
 0x115   :  { %p279_p9 = pnand %p277_p8, %p274_p7 }
 0x117   :  { %282 = shalt.err (!%p279_p9)
}
 0x118   :  { %177 = dma.vmem_to_hbm [thread:$0]  %s172_s12, 256, %s365_s3, [#allocation4], %s290_s22, %s290_s22, %s291_s23  }
 0x119   :  { %287 = dma.done.wait [#allocation4], 256  }
 0x11a   :  { %288 = vsyncadd [#allocation4], 4294967040 }
 0x11b   :  { %181 = vsyncpa [#allocation3], 1 }
 0x11c   :  { %182 = vsyncpa [#allocation6], 1 }
 0x11d   :  { %183 = vsyncpa [#allocation4], 1 }

</bundles_post_ra>
